<compile_context>
chip_gen: v7x
topology: tpu7x:2x2x1
jax: 0.10.0
libtpu: 0.0.40
codegen_flags: <defaults>
</compile_context>

<pallas_src>
import math

import jax
import jax.numpy as jnp
from jax.experimental import pallas as pl
from jax.experimental.pallas import tpu as pltpu

_TARGET_BLOCK_BYTES = 2 << 20   # ~2 MiB per plane per grid step
_MIN_GRID_STEPS = 4             # >= 2 blocks per core on a v7x megacore
_MAX_LANE = 512


def _window_mul_kernel(xr_ref, xi_ref, w_ref, or_ref, oi_ref):
    # xr/xi: (tile_rows, lane) float32;  w: (1, lane) -> broadcasts over rows.
    w = w_ref[...]
    or_ref[...] = xr_ref[...] * w
    oi_ref[...] = xi_ref[...] * w


def _choose_lane(plane_total, d, max_lane=_MAX_LANE):
    """Lane width: a multiple of d (window tiles exactly per row) and of 128
    (unmasked stores) when shapes allow, dividing plane_total."""
    lcm = d * 128 // math.gcd(d, 128)
    if plane_total % lcm != 0:
        # Rare "awkward doppler length" fallback: lane == full last dim.
        # Zero extra HBM passes; stores may be masked (vst.msk) but correct.
        return d
    lane = lcm
    while (lane * 2 <= max_lane and plane_total % (lane * 2) == 0
           and plane_total // (lane * 2) >= 8):
        lane *= 2
    return lane


def _choose_tile_rows(new_rows, lane):
    """Multiple-of-8 divisor of new_rows giving ~2 MiB blocks and >= 4 grid
    steps on large inputs; tiny inputs run as a single block (grid=(1,))."""
    plane_bytes = new_rows * lane * 4
    if plane_bytes <= _TARGET_BLOCK_BYTES or new_rows <= 8:
        return new_rows                      # single block, no pipeline steps
    target = min(_TARGET_BLOCK_BYTES // (lane * 4),
                 max(8, new_rows // _MIN_GRID_STEPS))
    target = max(8, (min(target, new_rows) // 8) * 8)
    t = target
    while t >= 8:
        if new_rows % t == 0:
            return t
        t -= 8
    return None        # new_rows has no multiple-of-8 divisor (rare)


@jax.jit
def hamming_window_doppler(complex_adc, window):
    """complex_adc: complex64 (..., D); window: float (D,)."""
    orig_shape = complex_adc.shape
    d = orig_shape[-1]
    assert window.shape == (d,), "window must match the doppler (last) axis"

    xr = jnp.real(complex_adc).astype(jnp.float32)
    xi = jnp.imag(complex_adc).astype(jnp.float32)
    plane_total = xr.size

    lane = _choose_lane(plane_total, d)
    # Every lane row must start on a doppler-group boundary or the tiled
    # window would silently mis-align against the data.
    assert lane % d == 0 and plane_total % lane == 0
    new_rows = plane_total // lane

    xr2 = xr.reshape(new_rows, lane)         # contiguous reshapes: no copies
    xi2 = xi.reshape(new_rows, lane)

    tile_rows = _choose_tile_rows(new_rows, lane)
    pad_rows = 0
    if tile_rows is None:
        # Rare: large input whose row count has no multiple-of-8 divisor.
        # Pad at most 7 rows (tiny copy) -- never concatenate the whole cube.
        pad_rows = (-new_rows) % 8
        xr2 = jnp.pad(xr2, ((0, pad_rows), (0, 0)))
        xi2 = jnp.pad(xi2, ((0, pad_rows), (0, 0)))
        new_rows += pad_rows
        tile_rows = _choose_tile_rows(new_rows, lane)

    grid = (new_rows // tile_rows,)

    # Tile the window across the lane so every (row, lane) block reuses it.
    w_lane = jnp.tile(window.astype(jnp.float32), lane // d).reshape(1, lane)

    data_spec = pl.BlockSpec((tile_rows, lane), lambda i: (i, 0))
    win_spec = pl.BlockSpec((1, lane), lambda i: (0, 0))

    out_r, out_i = pl.pallas_call(
        _window_mul_kernel,
        out_shape=(jax.ShapeDtypeStruct((new_rows, lane), jnp.float32),
                   jax.ShapeDtypeStruct((new_rows, lane), jnp.float32)),
        grid_spec=pltpu.PrefetchScalarGridSpec(
            num_scalar_prefetch=0,
            grid=grid,
            in_specs=[data_spec, data_spec, win_spec],
            out_specs=[data_spec, data_spec],
        ),
        compiler_params=pltpu.CompilerParams(
            dimension_semantics=("parallel",),
            vmem_limit_bytes=32 << 20),
        cost_estimate=pl.CostEstimate(
            flops=2 * plane_total,
            transcendentals=0,
            bytes_accessed=4 * plane_total * 4 + lane * 4),
    )(xr2, xi2, w_lane)

    if pad_rows:
        out_r = out_r[:new_rows - pad_rows]
        out_i = out_i[:new_rows - pad_rows]
    return jax.lax.complex(out_r.reshape(orig_shape), out_i.reshape(orig_shape))


def make_hanning_window(n):
    # TODO(synk): the original module loads 'hanning_window_dopller.npy' from
    # disk; despite the class being named Hamming_window_doppler, the stored
    # coefficients are a Hann window, so we synthesize a Hann window of the
    # doppler length instead of reading a file.
    if n == 1:
        return jnp.ones((1,), jnp.float32)
    k = jnp.arange(n, dtype=jnp.float32)
    return 0.5 - 0.5 * jnp.cos(2.0 * jnp.pi * k / (n - 1))


def reference(complex_adc, window):
    return complex_adc * window.astype(jnp.float32)


if __name__ == "__main__":
    key = jax.random.PRNGKey(0)

    def run_case(shape):
        kr, ki = jax.random.split(jax.random.fold_in(key, shape[-1]))
        re = jax.random.normal(kr, shape, dtype=jnp.float32)
        im = jax.random.normal(ki, shape, dtype=jnp.float32)
        complex_adc = jax.lax.complex(re, im)          # complex64
        window = make_hanning_window(shape[-1])
        out = jax.block_until_ready(hamming_window_doppler(complex_adc, window))
        ref = reference(complex_adc, window)
        assert out.shape == complex_adc.shape
        assert out.dtype == jnp.complex64
        assert jnp.allclose(out, ref, atol=1e-6, rtol=1e-6)

    # batch=2, channels=4, range bins=16, doppler bins=16 (lane-dense path).
    run_case((2, 4, 16, 16))
    # Awkward doppler length -> lane == D fallback (masked stores, still exact).
    run_case((3, 5, 7, 50))

    print("KERNEL_OK")
</pallas_src>

<mosaic_0001>
module attributes {stable_mosaic.version = 11 : i64} {
  func.func @_window_mul_kernel(%arg0: i32, %arg1: memref<8x256xf32, #tpu.memory_space<vmem>>, %arg2: memref<8x256xf32, #tpu.memory_space<vmem>>, %arg3: memref<1x256xf32, #tpu.memory_space<vmem>>, %arg4: memref<8x256xf32, #tpu.memory_space<vmem>>, %arg5: memref<8x256xf32, #tpu.memory_space<vmem>>) attributes {dimension_semantics = [#tpu.dimension_semantics<parallel>], iteration_bounds = array<i64: 1>, scalar_prefetch = 0 : i64, scratch_operands = 0 : i64, tpu.core_type = #tpu.core_type<tc>, window_params = [{transform_indices = @transform_0, window_bounds = array<i64: 8, 256>}, {transform_indices = @transform_1, window_bounds = array<i64: 8, 256>}, {pipeline_mode = #tpu.pipeline_mode<synchronous>, transform_indices = @transform_2, window_bounds = array<i64: 1, 256>}, {transform_indices = @transform_3, window_bounds = array<i64: 8, 256>}, {transform_indices = @transform_4, window_bounds = array<i64: 8, 256>}]} {
    %c0 = arith.constant 0 : index
    %c0_0 = arith.constant 0 : index
    %0 = vector.load %arg3[%c0, %c0_0] : memref<1x256xf32, #tpu.memory_space<vmem>>, vector<1x256xf32>
    %c0_1 = arith.constant 0 : index
    %c0_2 = arith.constant 0 : index
    %1 = vector.load %arg1[%c0_1, %c0_2] : memref<8x256xf32, #tpu.memory_space<vmem>>, vector<8x256xf32>
    %2 = vector.broadcast %0 : vector<1x256xf32> to vector<8x256xf32>
    %3 = arith.mulf %1, %2 : vector<8x256xf32>
    %c0_3 = arith.constant 0 : index
    %c0_4 = arith.constant 0 : index
    %4 = vector.load %arg4[%c0_3, %c0_4] : memref<8x256xf32, #tpu.memory_space<vmem>>, vector<8x256xf32>
    tpu.vector_store %arg4[%c0_3, %c0_4], %3 {strides = array<i32>} : memref<8x256xf32, #tpu.memory_space<vmem>>, vector<8x256xf32>,
    %c0_5 = arith.constant 0 : index
    %c0_6 = arith.constant 0 : index
    %5 = vector.load %arg2[%c0_5, %c0_6] : memref<8x256xf32, #tpu.memory_space<vmem>>, vector<8x256xf32>
    %6 = vector.broadcast %0 : vector<1x256xf32> to vector<8x256xf32>
    %7 = arith.mulf %5, %6 : vector<8x256xf32>
    %c0_7 = arith.constant 0 : index
    %c0_8 = arith.constant 0 : index
    %8 = vector.load %arg5[%c0_7, %c0_8] : memref<8x256xf32, #tpu.memory_space<vmem>>, vector<8x256xf32>
    tpu.vector_store %arg5[%c0_7, %c0_8], %7 {strides = array<i32>} : memref<8x256xf32, #tpu.memory_space<vmem>>, vector<8x256xf32>,
    return
  }
  func.func @transform_0(%arg0: i32) -> (i32, i32) {
    %c0_i32 = arith.constant 0 : i32
    %c0_i32_0 = arith.constant 0 : i32
    return %arg0, %c0_i32 : i32, i32
  }
  func.func @transform_1(%arg0: i32) -> (i32, i32) {
    %c0_i32 = arith.constant 0 : i32
    %c0_i32_0 = arith.constant 0 : i32
    return %arg0, %c0_i32 : i32, i32
  }
  func.func @transform_2(%arg0: i32) -> (i32, i32) {
    %c0_i32 = arith.constant 0 : i32
    %c0_i32_0 = arith.constant 0 : i32
    %c0_i32_1 = arith.constant 0 : i32
    return %c0_i32, %c0_i32_0 : i32, i32
  }
  func.func @transform_3(%arg0: i32) -> (i32, i32) {
    %c0_i32 = arith.constant 0 : i32
    %c0_i32_0 = arith.constant 0 : i32
    return %arg0, %c0_i32 : i32, i32
  }
  func.func @transform_4(%arg0: i32) -> (i32, i32) {
    %c0_i32 = arith.constant 0 : i32
    %c0_i32_0 = arith.constant 0 : i32
    return %arg0, %c0_i32 : i32, i32
  }
}

</mosaic_0001>

<bundles_post_ra>
// kernel: custom-call.1
= control target key start
LH: loop header
LB: loop body
LE: loop exit
PB: predicated region body
PF: predicated region fallthrough
CT: control target
= control target key end

     0   :  { %s59_s0 = inlined_call_operand.hbm [shape: c64[2,4,16,16], index: 0, kind: input, shape index: {}]   ;;  %s60_s1 = inlined_call_operand.vmem [shape: f32[2,4,16,16], index: 1, kind: output, shape index: {}]  }
   0x1   :  { %s2_s8 = scalar_lea.hbm %s59_s0, 2048 }
   0x2   :  { %3 = vsyncpa [#allocation0], 0  ;;  %s4_s11 = sshll.u32 %s60_s1, 4  ;;  %s34_s14 = scalar_lea.hbm %s59_s0, 4096  ;;  %s5_s11 = int_to_ptr.vmem [resolvable:$true] %s4_s11 }
   0x3   :  { %p11_p0 = scmp.ne.s32.totalorder %s2_s8, %s34_s14  ;;  %p13_p1 = scmp.lt.u32.totalorder %s2_s8, %s59_s0 }
   0x4   :  { %p14_p2 = scmp.lt.u32.totalorder %s34_s14, %s34_s14  ;;  %p16_p4 = scmp.lt.u32.totalorder %s34_s14, %s2_s8 }
   0x6   :  { %p15_p3 = por %p14_p2, %p13_p1 }
   0x8   :  { %p17_p5 = por %p16_p4, %p15_p3 }
   0xa   :  { %p18_p6 = pnand %p17_p5, %p11_p0 }
   0xc   :  { %21 = shalt.err (!%p18_p6)  }
   0xd   :  { %s22_s17 = scalar_lea.vmem %s5_s11, 2048  ;;  %p27_p8 = scmp.lt.s32.totalorder %s5_s11, %s5_s11 }
   0xe   :  { %p23_p7 = scmp.ne.s32.totalorder %s5_s11, %s22_s17  ;;  %p28_p9 = scmp.lt.s32.totalorder %s22_s17, %s22_s17 }
  0x10   :  { %p29_p10 = por %p28_p9, %p27_p8 }
  0x12   :  { %p30_p11 = pnand %p29_p10, %p23_p7 }
  0x14   :  { %33 = shalt.err (!%p30_p11)  }
  0x15   :  { %7 = dma.hbm_to_vmem [thread:$0]  %s2_s8, 2048, %s5_s11, [#allocation0] }
  0x16   :  { %35 = dma.done.wait [#allocation0], 2048  }
  0x17   :  { %36 = vsyncadd [#allocation0], 4294965248 }
  0x18   :  { %9 = vsyncpa [#allocation0], 1 }

// kernel: tile.9
= control target key start
LH: loop header
LB: loop body
LE: loop exit
PB: predicated region body
PF: predicated region fallthrough
CT: control target
= control target key end

     0   :  { %s7_s6 = smov 3  ;;  %s21_s9 = smov 3  ;;  %vm4_vm0 = vcmask 130048   ;;  %vm11_vm1 = vcmask 1048448   ;;  %vm18_vm2 = vcmask 917248   ;;  %vm25_vm3 = vcmask 786048   ;;  %s128_s0 = inlined_call_operand.vmem [shape: f32[16,16], index: 0, kind: input, shape index: {}]   ;;  %s129_s1 = inlined_call_operand.vmem [shape: f32[1,256], index: 1, kind: output, shape index: {}]  }
   0x1   :  { %v66_v0 = vld [vmem:[%s128_s0 + $0x7] ss:$8 sm:%s7_s6]   ;;  %s81_s10 = smov 112   ;;  %v68_v1 = vld [vmem:[%s128_s0 + $0x5] ss:$8 sm:%s21_s9]   ;;  %s14_s13 = smov 3 }
   0x2   :  { %9 = vrot.lane.b32.xlu0 %v66_v0, %s81_s10  ;;  %s82_s14 = smov 80   ;;  %v67_v2 = vld [vmem:[%s128_s0 + $0x6] ss:$8 sm:%s14_s13]   ;;  %s28_s17 = smov 3  ;;  %vm32_vm4 = vcmask 654848   ;;  %vm39_vm5 = vcmask 523648  }
   0x3   :  { %23 = vrot.lane.b32.xlu1 %v68_v1, %s82_s14  ;;  %v69_v3 = vld [vmem:[%s128_s0 + $0x4] ss:$8 sm:%s28_s17]   ;;  %s35_s20 = smov 3  ;;  %s42_s21 = smov 3  ;;  %vm46_vm6 = vcmask 392448   ;;  %vm53_vm7 = vcmask 261248  }
   0x4   :  { %s83_s22 = smov 96   ;;  %s84_s23 = smov 64   ;;  %v70_v4 = vld [vmem:[%s128_s0 + $0x3] ss:$8 sm:%s35_s20]   ;;  %v71_v5 = vld [vmem:[%s128_s0 + $0x2] ss:$8 sm:%s42_s21]  }
   0x5   :  { %s2_s26 = smov 3  ;;  %s49_s29 = smov 3 }
   0x6   :  { %16 = vrot.lane.b32.xlu0 %v67_v2, %s83_s22  ;;  %v3_v6 = vld [vmem:[%s128_s0] ss:$8 sm:%s2_s26]   ;;  %s85_s3 = smov 48   ;;  %s86_s4 = smov 32  }
   0x7   :  { %30 = vrot.lane.b32.xlu1 %v69_v3, %s84_s23  ;;  %5 = vst.msk [vmem:[#allocation0] ss:$8 sm:$0x3] %vm4_vm0, %v3_v6   ;;  %v72_v7 = vld [vmem:[%s128_s0 + $0x1] ss:$8 sm:%s49_s29]   ;;  %s87_s0 = smov 16  }
   0xa   :  { %37 = vrot.lane.b32.xlu0 %v70_v4, %s85_s3 }
   0xb   :  { %44 = vrot.lane.b32.xlu1 %v71_v5, %s86_s4 }
   0xe   :  { %51 = vrot.lane.b32.xlu0 %v72_v7, %s87_s0 }
  0x74   :  { %v10_v8 = vpop.permute.xlu0 %9  }
  0x75   :  { %12 = vst.msk [vmem:[#allocation0] ss:$8 sm:$0x3] %vm11_vm1, %v10_v8   ;;  %v24_v9 = vpop.permute.xlu1 %23  }
  0x78   :  { %v17_v10 = vpop.permute.xlu0 %16  }
  0x79   :  { %19 = vst.msk [vmem:[#allocation0] ss:$8 sm:$0x3] %vm18_vm2, %v17_v10   ;;  %v31_v11 = vpop.permute.xlu1 %30  }
  0x7a   :  { %26 = vst.msk [vmem:[#allocation0] ss:$8 sm:$0x3] %vm25_vm3, %v24_v9  }
  0x7b   :  { %33 = vst.msk [vmem:[#allocation0] ss:$8 sm:$0x3] %vm32_vm4, %v31_v11  }
  0x7c   :  { %v38_v12 = vpop.permute.xlu0 %37  }
  0x7d   :  { %40 = vst.msk [vmem:[#allocation0] ss:$8 sm:$0x3] %vm39_vm5, %v38_v12   ;;  %v45_v13 = vpop.permute.xlu1 %44  }
  0x7e   :  { %47 = vst.msk [vmem:[#allocation0] ss:$8 sm:$0x3] %vm46_vm6, %v45_v13  }
  0x80   :  { %v52_v14 = vpop.permute.xlu0 %51  }
  0x81   :  { %54 = vst.msk [vmem:[#allocation0] ss:$8 sm:$0x3] %vm53_vm7, %v52_v14  }
  0x88   :  { %v58_v15 = vld [vmem:[#allocation0] sm:$0x1]  ;;  %v62_v16 = vld [vmem:[#allocation0 + $0x8] sm:$0x1] }
  0x89   :  { %60 = vst [vmem:[%s129_s1] sm:$0x1] %v58_v15  ;;  %73 = vst [vmem:[%s129_s1 + $0x1] sm:$0x1] %v62_v16 }

// kernel: tile.8
= control target key start
LH: loop header
LB: loop body
LE: loop exit
PB: predicated region body
PF: predicated region fallthrough
CT: control target
= control target key end

     0   :  { %2 = vsyncpa [#allocation1], 0  ;;  %s47_s6 = smov [#allocation0]   ;;  %s76_s0 = inlined_call_operand.hbm [shape: f32[16], index: 0, kind: input, shape index: {}]   ;;  %s77_s1 = inlined_call_operand.vmem [shape: f32[16,16], index: 1, kind: output, shape index: {}]  }
   0x1   :  { %s9_s7 = sshll.u32 %s47_s6, 4  ;;  %s23_s10 = scalar_lea.hbm %s76_s0, 16  ;;  %s10_s7 = int_to_ptr.vmem [resolvable:$true] %s9_s7 }
   0x2   :  { %p24_p0 = scmp.ne.s32.totalorder %s76_s0, %s23_s10  ;;  %p27_p1 = scmp.lt.u32.totalorder %s23_s10, %s76_s0 }
   0x4   :  { %p29_p2 = pnand %p27_p1, %p24_p0 }
   0x6   :  { %32 = shalt.err (!%p29_p2)
}
   0x7   :  { %s33_s15 = scalar_lea.vmem %s10_s7, 16  ;;  %s37_s16 = scalar_lea.vmem %s10_s7, 32 }
   0x8   :  { %p34_p3 = scmp.ne.s32.totalorder %s10_s7, %s33_s15  ;;  %p38_p4 = scmp.lt.s32.totalorder %s10_s7, %s10_s7 }
   0x9   :  { %p39_p5 = scmp.lt.s32.totalorder %s37_s16, %s33_s15 }
   0xb   :  { %p40_p6 = por %p39_p5, %p38_p4 }
   0xd   :  { %p41_p7 = pnand %p40_p6, %p34_p3 }
   0xf   :  { %44 = shalt.err (!%p41_p7)
}
  0x10   :  { %12 = dma.hbm_to_vmem [thread:$0]  %s76_s0, 16, %s10_s7, [#allocation1]  }
  0x11   :  { %45 = dma.done.wait [#allocation1], 16  }
  0x12   :  { %46 = vsyncadd [#allocation1], 4294967280  ;;  %v16_v0 = vld [vmem:[#allocation0] ss:$0 sm:$0xff] }
  0x13   :  { %17 = vst [vmem:[%s77_s1] sm:$0xff] %v16_v0  ;;  %21 = vst [vmem:[%s77_s1 + $0x8] sm:$0xff] %v16_v0 }
  0x14   :  { %20 = vsyncpa [#allocation1], 1 }

// kernel: custom-call
= control target key start
LH: loop header
LB: loop body
LE: loop exit
PB: predicated region body
PF: predicated region fallthrough
CT: control target
= control target key end

     0   :  { %2 = vsyncpa [#allocation0], 0  ;;  %s61_s0 = inlined_call_operand.hbm [shape: c64[2,4,16,16], index: 0, kind: input, shape index: {}]   ;;  %s62_s1 = inlined_call_operand.vmem [shape: f32[2,4,16,16], index: 1, kind: output, shape index: {}]  }
   0x1   :  { %s3_s8 = sshll.u32 %s62_s1, 4  ;;  %s9_s11 = scalar_lea.hbm %s61_s0, 2048  ;;  %s4_s8 = int_to_ptr.vmem [resolvable:$true] %s3_s8 }
   0x2   :  { %p10_p0 = scmp.ne.s32.totalorder %s61_s0, %s9_s11  ;;  %s11_s16 = scalar_lea.hbm %s61_s0, 4096 }
   0x3   :  { %p12_p1 = scmp.lt.u32.totalorder %s11_s16, %s9_s11  ;;  %p13_p2 = scmp.lt.u32.totalorder %s9_s11, %s61_s0 }
   0x5   :  { %p14_p3 = por %p13_p2, %p12_p1 }
   0x7   :  { %p15_p4 = pnand %p14_p3, %p10_p0 }
   0x9   :  { %18 = shalt.err (!%p15_p4)  }
   0xa   :  { %s19_s1 = scalar_lea.vmem %s4_s8, 2048  ;;  %p24_p6 = scmp.lt.s32.totalorder %s4_s8, %s4_s8 }
   0xb   :  { %p20_p5 = scmp.ne.s32.totalorder %s4_s8, %s19_s1  ;;  %p25_p7 = scmp.lt.s32.totalorder %s19_s1, %s19_s1 }
   0xd   :  { %p26_p8 = por %p25_p7, %p24_p6 }
   0xf   :  { %p27_p9 = pnand %p26_p8, %p20_p5 }
  0x11   :  { %30 = shalt.err (!%p27_p9)  }
  0x12   :  { %6 = dma.hbm_to_vmem [thread:$0]  %s61_s0, 2048, %s4_s8, [#allocation0] }
  0x13   :  { %31 = dma.done.wait [#allocation0], 2048  }
  0x14   :  { %32 = vsyncadd [#allocation0], 4294965248 }
  0x15   :  { %8 = vsyncpa [#allocation0], 1 }

// kernel: custom-call.2
= control target key start
LH: loop header
LB: loop body
LE: loop exit
PB: predicated region body
PF: predicated region fallthrough
CT: control target
= control target key end

     0   :  { %s126_s0 = inlined_call_operand.vmem [shape: f32[2,4,16,16], index: 0, kind: input, shape index: {}]   ;;  %s127_s1 = inlined_call_operand.vmem [shape: f32[2,4,16,16], index: 1, kind: input, shape index: {}]   ;;  %s128_s2 = inlined_call_operand.hbm [shape: c64[2,4,16,16], index: 2, kind: output, shape index: {}]  }
   0x1   :  { %s87_s11 = scalar_lea.hbm %s128_s2, 2048 }
   0x2   :  { %4 = vsyncpa [#allocation0], 0  ;;  %s5_s14 = sshll.u32 %s126_s0, 4  ;;  %s6_s14 = int_to_ptr.vmem [resolvable:$true] %s5_s14 }
   0x3   :  { %s18_s15 = scalar_lea.vmem %s6_s14, 2048  ;;  %p23_p1 = scmp.lt.s32.totalorder %s6_s14, %s6_s14 }
   0x4   :  { %p19_p0 = scmp.ne.s32.totalorder %s6_s14, %s18_s15  ;;  %p24_p2 = scmp.lt.s32.totalorder %s18_s15, %s18_s15 }
   0x6   :  { %p25_p3 = por %p24_p2, %p23_p1 }
   0x8   :  { %p26_p4 = pnand %p25_p3, %p19_p0 }
   0xa   :  { %29 = shalt.err (!%p26_p4)  }
   0xb   :  { %p31_p5 = scmp.ne.s32.totalorder %s128_s2, %s87_s11  ;;  %s32_s0 = scalar_lea.hbm %s128_s2, 4096 }
   0xc   :  { %p33_p6 = scmp.lt.u32.totalorder %s32_s0, %s87_s11  ;;  %p34_p7 = scmp.lt.u32.totalorder %s87_s11, %s128_s2 }
   0xe   :  { %p35_p8 = por %p34_p7, %p33_p6 }
  0x10   :  { %p36_p9 = pnand %p35_p8, %p31_p5 }
  0x12   :  { %39 = shalt.err (!%p36_p9)  }
  0x13   :  { %8 = dma.vmem_to_hbm [thread:$0]  %s6_s14, 2048, %s128_s2, [#allocation0] }
  0x14   :  { %65 = dma.done.wait [#allocation0], 2048  }
  0x15   :  { %66 = vsyncadd [#allocation0], 4294965248 }
  0x16   :  { %10 = vsyncpa [#allocation0], 1 }
  0x17   :  { %11 = vsyncpa [#allocation1], 0  ;;  %s12_s28 = sshll.u32 %s127_s1, 4  ;;  %s13_s28 = int_to_ptr.vmem [resolvable:$true] %s12_s28 }
  0x18   :  { %s40_s29 = scalar_lea.vmem %s13_s28, 2048  ;;  %p45_p11 = scmp.lt.s32.totalorder %s13_s28, %s13_s28 }
  0x19   :  { %p41_p10 = scmp.ne.s32.totalorder %s13_s28, %s40_s29  ;;  %p46_p12 = scmp.lt.s32.totalorder %s40_s29, %s40_s29 }
  0x1b   :  { %p47_p13 = por %p46_p12, %p45_p11 }
  0x1d   :  { %p48_p0 = pnand %p47_p13, %p41_p10 }
  0x1f   :  { %51 = shalt.err (!%p48_p0)  }
  0x20   :  { %p53_p1 = scmp.ne.s32.totalorder %s87_s11, %s32_s0  ;;  %p56_p2 = scmp.lt.u32.totalorder %s32_s0, %s32_s0 }
  0x22   :  { %p57_p3 = por %p56_p2, %p34_p7 }
  0x24   :  { %p59_p4 = por %p57_p3, %p33_p6 }
  0x26   :  { %p60_p5 = pnand %p59_p4, %p53_p1 }
  0x28   :  { %63 = shalt.err (!%p60_p5)  }
  0x29   :  { %15 = dma.vmem_to_hbm [thread:$0]  %s13_s28, 2048, %s87_s11, [#allocation1] }
  0x2a   :  { %67 = dma.done.wait [#allocation1], 2048  }
  0x2b   :  { %68 = vsyncadd [#allocation1], 4294965248 }
  0x2c   :  { %17 = vsyncpa [#allocation1], 1 }

// kernel: hamming_window_doppler.1
= control target key start
LH: loop header
LB: loop body
LE: loop exit
PB: predicated region body
PF: predicated region fallthrough
CT: control target
= control target key end

     0   :  { %v20_v0 = vlaneseq  ;;  %s100_s2 = inlined_call_operand.vmem [shape: f32[1,256], index: 2, kind: input, shape index: {}]   ;;  %s101_s0 = inlined_call_operand.vmem [shape: f32[8,256], index: 0, kind: input, shape index: {}]   ;;  %s102_s1 = inlined_call_operand.vmem [shape: f32[8,256], index: 1, kind: input, shape index: {}]   ;;  %s103_s3 = inlined_call_operand.vmem [shape: f32[8,256], index: 3, kind: output, shape index: {0}]   ;;  %s104_s4 = inlined_call_operand.vmem [shape: f32[8,256], index: 4, kind: output, shape index: {1}]  }
   0x1   :  { %v16_v2 = vld [vmem:[%s100_s2] sm:$0x3]  ;;  %v18_v6 = vld [vmem:[%s101_s0 + $0x8] sm:$0xff] }
   0x2   :  { %v21_v1 = vshrl.u32 %v20_v0, 7  ;;  %v17_v3 = vld [vmem:[%s101_s0] sm:$0xff]  ;;  %v35_v8 = vld [vmem:[%s102_s1 + $0x8] sm:$0xff] }
   0x3   :  { %v34_v7 = vld [vmem:[%s102_s1] sm:$0xff] }
   0x4   :  { %v22_v4 = vsub.s32 0, %v21_v1  ;;  %v26_v5 = vsub.s32 1, %v21_v1 }
   0x6   :  { %v23_v9 = vrot.slane %v16_v2, %v22_v4  ;;  %v27_v10 = vrot.slane %v16_v2, %v26_v5 }
   0x8   :  { %v30_v11 = vmul.f32 %v23_v9, %v17_v3  ;;  %v31_v12 = vmul.f32 %v27_v10, %v18_v6  ;;  %v36_v13 = vmul.f32 %v34_v7, %v23_v9  ;;  %v37_v14 = vmul.f32 %v35_v8, %v27_v10 }
   0xa   :  { %32 = vst [vmem:[%s103_s3] sm:$0xff] %v30_v11  ;;  %33 = vst [vmem:[%s103_s3 + $0x8] sm:$0xff] %v31_v12 }
   0xb   :  { %38 = vst [vmem:[%s104_s4] sm:$0xff] %v36_v13  ;;  %39 = vst [vmem:[%s104_s4 + $0x8] sm:$0xff] %v37_v14 }

</bundles_post_ra>
